<compile_context>
chip_gen: v7x
topology: tpu7x:2x2x1
jax: 0.10.0
libtpu: 0.0.40
codegen_flags: <defaults>
</compile_context>

<pallas_src>
import functools

import jax
import jax.numpy as jnp
from jax import lax
from jax.experimental import pallas as pl
from jax.experimental.pallas import tpu as pltpu


def _make_kernel(classes: int, items: int, hidden: int, batch: int):
    c1 = classes + 1
    flat = items * classes
    inv_batch = 1.0 / float(batch)

    def kernel(data_ref, wf_ref, w2_ref, slab_ref, out_ref):
        d = data_ref[...]                                            # (B, items) int32
        b = d.shape[0]

        # ---- one-hot(data) flattened to (B, items*classes), built on the VPU ----
        col = lax.broadcasted_iota(jnp.int32, (b, flat), 1)          # lane index 0..flat-1
        oh = jnp.zeros((b, flat), jnp.float32)
        for i in range(items):                                       # static unroll (items is small)
            oh = oh + jnp.where(col == (d[:, i:i + 1] + i * classes), 1.0, 0.0)

        # ---- fused Embedding + Linear1 (emb @ W1 folded at trace time), ReLU ----
        h = jnp.dot(oh, wf_ref[...], preferred_element_type=jnp.float32)   # (B, hidden)
        h = jnp.maximum(h + slab_ref[0:1, :hidden], 0.0)

        # ---- Linear2 -> logits ----
        logits = jnp.dot(h, w2_ref[...], preferred_element_type=jnp.float32)  # (B, classes+1)
        logits = logits + slab_ref[1:2, :c1]

        # ---- target = round(data.float() @ weight) % classes  (VPU only, no MXU) ----
        dataf = d.astype(jnp.float32)
        wrow = slab_ref[2:3, :items]                                 # (1, items)
        tf = jnp.sum(dataf * wrow, axis=-1, keepdims=True)           # (B, 1)
        tgt = jnp.round(tf).astype(jnp.int32) % classes              # (B, 1) int32 in [0, classes)

        # ---- cross_entropy with mean reduction ----
        m = jnp.max(logits, axis=-1, keepdims=True)
        lse = m + jnp.log(jnp.sum(jnp.exp(logits - m), axis=-1, keepdims=True))   # (B, 1)
        cls = lax.broadcasted_iota(jnp.int32, (b, c1), 1)            # int compare (no fp equality)
        sel = jnp.sum(jnp.where(cls == tgt, logits, 0.0), axis=-1, keepdims=True)  # (B, 1)
        out_ref[...] = jnp.sum(lse - sel, axis=0, keepdims=True) * inv_batch

    return kernel


@functools.partial(jax.jit, static_argnames=("classes", "items", "features", "hidden"))
def model_forward(data, emb_table, w1, b1, w2, b2, weight_buf,
                  *, classes: int, items: int, features: int, hidden: int):
    """data: (batch, items) int32 in [0, classes). Returns scalar CE loss (f32)."""
    batch = data.shape[0]
    c1 = classes + 1

    # Parameter-only, trace-time folding:
    #   wf[i*classes + c, :] = emb[c, :] @ w1[i*features:(i+1)*features, :]
    # so that one-hot(data) @ wf == Linear1(Flatten(Embedding(data))).
    wf = jnp.einsum(
        "cf,ifh->ich",
        emb_table.astype(jnp.float32),
        w1.astype(jnp.float32).reshape(items, features, hidden),
    ).reshape(items * classes, hidden)

    # Pack the three small vectors into a single operand (one DMA instead of three).
    lane = max(hidden, c1, items)
    slab = jnp.zeros((3, lane), jnp.float32)
    slab = slab.at[0, :hidden].set(b1.astype(jnp.float32))
    slab = slab.at[1, :c1].set(b2.astype(jnp.float32))
    slab = slab.at[2, :items].set(weight_buf.astype(jnp.float32))

    vmem = pl.BlockSpec(memory_space=pltpu.MemorySpace.VMEM)
    out = pl.pallas_call(
        _make_kernel(classes, items, hidden, batch),
        out_shape=jax.ShapeDtypeStruct((1, 1), jnp.float32),
        in_specs=[vmem] * 4,
        out_specs=vmem,
    )(data.astype(jnp.int32), wf, w2.astype(jnp.float32), slab)
    # TODO(synk): if this is called in a loop, add a 1-D grid over calls with
    # constant index_maps for wf/w2/slab so the weights stay resident in VMEM.
    return out[0, 0]


if __name__ == "__main__":
    classes, items, features, hidden = 10, 8, 4, 32
    batch = 16  # fixed by the PyTorch forward()

    key = jax.random.PRNGKey(0)
    k_data, k_emb, k_w1, k_b1, k_w2, k_b2, k_wbuf = jax.random.split(key, 7)

    # Deterministic parameter init (shapes per the nn.Module __init__).
    emb_table = jax.random.normal(k_emb, (classes, features), jnp.float32)            # Embedding weight
    lim1 = 1.0 / jnp.sqrt(items * features)
    w1 = jax.random.uniform(k_w1, (items * features, hidden), jnp.float32, -lim1, lim1)
    b1 = jax.random.uniform(k_b1, (hidden,), jnp.float32, -lim1, lim1)
    lim2 = 1.0 / jnp.sqrt(hidden)
    w2 = jax.random.uniform(k_w2, (hidden, classes + 1), jnp.float32, -lim2, lim2)
    b2 = jax.random.uniform(k_b2, (classes + 1,), jnp.float32, -lim2, lim2)
    weight_buf = jax.random.normal(k_wbuf, (items,), jnp.float32)                      # nn.Buffer

    # forward() draws its own random integer batch; we draw it deterministically here.
    data = jax.random.randint(k_data, (batch, items), 0, classes, dtype=jnp.int32)

    loss = model_forward(data, emb_table, w1, b1, w2, b2, weight_buf,
                         classes=classes, items=items, features=features, hidden=hidden)
    jax.block_until_ready(loss)

    # Pure-JAX reference check of the same math.
    x_ref = emb_table[data].reshape(batch, items * features)
    h_ref = jnp.maximum(x_ref @ w1 + b1, 0.0)
    logits_ref = h_ref @ w2 + b2
    tgt_ref = jnp.mod(jnp.round(data.astype(jnp.float32) @ weight_buf), classes).astype(jnp.int32)
    lse_ref = jax.scipy.special.logsumexp(logits_ref, axis=-1)
    loss_ref = jnp.mean(lse_ref - logits_ref[jnp.arange(batch), tgt_ref])
    assert jnp.allclose(loss, loss_ref, rtol=1e-5, atol=1e-5), (loss, loss_ref)

    print("KERNEL_OK")
</pallas_src>

<mosaic_0001>
module attributes {stable_mosaic.version = 11 : i64} {
  func.func @kernel(%arg0: memref<16x8xi32, #tpu.memory_space<vmem>>, %arg1: memref<80x32xf32, #tpu.memory_space<vmem>>, %arg2: memref<32x11xf32, #tpu.memory_space<vmem>>, %arg3: memref<3x32xf32, #tpu.memory_space<vmem>>, %arg4: memref<1x1xf32, #tpu.memory_space<vmem>>) attributes {dimension_semantics = [], scalar_prefetch = 0 : i64, scratch_operands = 0 : i64, tpu.core_type = #tpu.core_type<tc>} {
    %c0 = arith.constant 0 : index
    %c0_0 = arith.constant 0 : index
    %0 = vector.load %arg0[%c0, %c0_0] : memref<16x8xi32, #tpu.memory_space<vmem>>, vector<16x8xi32>
    %1 = tpu.iota {dimensions = array<i32: 1>} : vector<16x80xi32>
    %cst = arith.constant 0.000000e+00 : f32
    %2 = vector.broadcast %cst : f32 to vector<16x80xf32>
    %3 = vector.extract_strided_slice %0 {offsets = [0, 0], sizes = [16, 1], strides = [1, 1]} : vector<16x8xi32> to vector<16x1xi32>
    %c0_i32 = arith.constant 0 : i32
    %4 = vector.broadcast %c0_i32 : i32 to vector<16x1xi32>
    %5 = arith.addi %3, %4 : vector<16x1xi32>
    %6 = vector.broadcast %5 : vector<16x1xi32> to vector<16x80xi32>
    %7 = arith.cmpi eq, %1, %6 : vector<16x80xi32>
    %cst_1 = arith.constant 1.000000e+00 : f32
    %cst_2 = arith.constant 0.000000e+00 : f32
    %8 = vector.broadcast %cst_1 : f32 to vector<16x80xf32>
    %9 = vector.broadcast %cst_2 : f32 to vector<16x80xf32>
    %10 = arith.select %7, %8, %9 : vector<16x80xi1>, vector<16x80xf32>
    %11 = arith.addf %2, %10 : vector<16x80xf32>
    %12 = vector.extract_strided_slice %0 {offsets = [0, 1], sizes = [16, 1], strides = [1, 1]} : vector<16x8xi32> to vector<16x1xi32>
    %c10_i32 = arith.constant 10 : i32
    %13 = vector.broadcast %c10_i32 : i32 to vector<16x1xi32>
    %14 = arith.addi %12, %13 : vector<16x1xi32>
    %15 = vector.broadcast %14 : vector<16x1xi32> to vector<16x80xi32>
    %16 = arith.cmpi eq, %1, %15 : vector<16x80xi32>
    %cst_3 = arith.constant 1.000000e+00 : f32
    %cst_4 = arith.constant 0.000000e+00 : f32
    %17 = vector.broadcast %cst_3 : f32 to vector<16x80xf32>
    %18 = vector.broadcast %cst_4 : f32 to vector<16x80xf32>
    %19 = arith.select %16, %17, %18 : vector<16x80xi1>, vector<16x80xf32>
    %20 = arith.addf %11, %19 : vector<16x80xf32>
    %21 = vector.extract_strided_slice %0 {offsets = [0, 2], sizes = [16, 1], strides = [1, 1]} : vector<16x8xi32> to vector<16x1xi32>
    %c20_i32 = arith.constant 20 : i32
    %22 = vector.broadcast %c20_i32 : i32 to vector<16x1xi32>
    %23 = arith.addi %21, %22 : vector<16x1xi32>
    %24 = vector.broadcast %23 : vector<16x1xi32> to vector<16x80xi32>
    %25 = arith.cmpi eq, %1, %24 : vector<16x80xi32>
    %cst_5 = arith.constant 1.000000e+00 : f32
    %cst_6 = arith.constant 0.000000e+00 : f32
    %26 = vector.broadcast %cst_5 : f32 to vector<16x80xf32>
    %27 = vector.broadcast %cst_6 : f32 to vector<16x80xf32>
    %28 = arith.select %25, %26, %27 : vector<16x80xi1>, vector<16x80xf32>
    %29 = arith.addf %20, %28 : vector<16x80xf32>
    %30 = vector.extract_strided_slice %0 {offsets = [0, 3], sizes = [16, 1], strides = [1, 1]} : vector<16x8xi32> to vector<16x1xi32>
    %c30_i32 = arith.constant 30 : i32
    %31 = vector.broadcast %c30_i32 : i32 to vector<16x1xi32>
    %32 = arith.addi %30, %31 : vector<16x1xi32>
    %33 = vector.broadcast %32 : vector<16x1xi32> to vector<16x80xi32>
    %34 = arith.cmpi eq, %1, %33 : vector<16x80xi32>
    %cst_7 = arith.constant 1.000000e+00 : f32
    %cst_8 = arith.constant 0.000000e+00 : f32
    %35 = vector.broadcast %cst_7 : f32 to vector<16x80xf32>
    %36 = vector.broadcast %cst_8 : f32 to vector<16x80xf32>
    %37 = arith.select %34, %35, %36 : vector<16x80xi1>, vector<16x80xf32>
    %38 = arith.addf %29, %37 : vector<16x80xf32>
    %39 = vector.extract_strided_slice %0 {offsets = [0, 4], sizes = [16, 1], strides = [1, 1]} : vector<16x8xi32> to vector<16x1xi32>
    %c40_i32 = arith.constant 40 : i32
    %40 = vector.broadcast %c40_i32 : i32 to vector<16x1xi32>
    %41 = arith.addi %39, %40 : vector<16x1xi32>
    %42 = vector.broadcast %41 : vector<16x1xi32> to vector<16x80xi32>
    %43 = arith.cmpi eq, %1, %42 : vector<16x80xi32>
    %cst_9 = arith.constant 1.000000e+00 : f32
    %cst_10 = arith.constant 0.000000e+00 : f32
    %44 = vector.broadcast %cst_9 : f32 to vector<16x80xf32>
    %45 = vector.broadcast %cst_10 : f32 to vector<16x80xf32>
    %46 = arith.select %43, %44, %45 : vector<16x80xi1>, vector<16x80xf32>
    %47 = arith.addf %38, %46 : vector<16x80xf32>
    %48 = vector.extract_strided_slice %0 {offsets = [0, 5], sizes = [16, 1], strides = [1, 1]} : vector<16x8xi32> to vector<16x1xi32>
    %c50_i32 = arith.constant 50 : i32
    %49 = vector.broadcast %c50_i32 : i32 to vector<16x1xi32>
    %50 = arith.addi %48, %49 : vector<16x1xi32>
    %51 = vector.broadcast %50 : vector<16x1xi32> to vector<16x80xi32>
    %52 = arith.cmpi eq, %1, %51 : vector<16x80xi32>
    %cst_11 = arith.constant 1.000000e+00 : f32
    %cst_12 = arith.constant 0.000000e+00 : f32
    %53 = vector.broadcast %cst_11 : f32 to vector<16x80xf32>
    %54 = vector.broadcast %cst_12 : f32 to vector<16x80xf32>
    %55 = arith.select %52, %53, %54 : vector<16x80xi1>, vector<16x80xf32>
    %56 = arith.addf %47, %55 : vector<16x80xf32>
    %57 = vector.extract_strided_slice %0 {offsets = [0, 6], sizes = [16, 1], strides = [1, 1]} : vector<16x8xi32> to vector<16x1xi32>
    %c60_i32 = arith.constant 60 : i32
    %58 = vector.broadcast %c60_i32 : i32 to vector<16x1xi32>
    %59 = arith.addi %57, %58 : vector<16x1xi32>
    %60 = vector.broadcast %59 : vector<16x1xi32> to vector<16x80xi32>
    %61 = arith.cmpi eq, %1, %60 : vector<16x80xi32>
    %cst_13 = arith.constant 1.000000e+00 : f32
    %cst_14 = arith.constant 0.000000e+00 : f32
    %62 = vector.broadcast %cst_13 : f32 to vector<16x80xf32>
    %63 = vector.broadcast %cst_14 : f32 to vector<16x80xf32>
    %64 = arith.select %61, %62, %63 : vector<16x80xi1>, vector<16x80xf32>
    %65 = arith.addf %56, %64 : vector<16x80xf32>
    %66 = vector.extract_strided_slice %0 {offsets = [0, 7], sizes = [16, 1], strides = [1, 1]} : vector<16x8xi32> to vector<16x1xi32>
    %c70_i32 = arith.constant 70 : i32
    %67 = vector.broadcast %c70_i32 : i32 to vector<16x1xi32>
    %68 = arith.addi %66, %67 : vector<16x1xi32>
    %69 = vector.broadcast %68 : vector<16x1xi32> to vector<16x80xi32>
    %70 = arith.cmpi eq, %1, %69 : vector<16x80xi32>
    %cst_15 = arith.constant 1.000000e+00 : f32
    %cst_16 = arith.constant 0.000000e+00 : f32
    %71 = vector.broadcast %cst_15 : f32 to vector<16x80xf32>
    %72 = vector.broadcast %cst_16 : f32 to vector<16x80xf32>
    %73 = arith.select %70, %71, %72 : vector<16x80xi1>, vector<16x80xf32>
    %74 = arith.addf %65, %73 : vector<16x80xf32>
    %c0_17 = arith.constant 0 : index
    %c0_18 = arith.constant 0 : index
    %75 = vector.load %arg1[%c0_17, %c0_18] : memref<80x32xf32, #tpu.memory_space<vmem>>, vector<80x32xf32>
    %cst_19 = arith.constant dense<0.000000e+00> : vector<16x32xf32>
    %76 = tpu.matmul %74, %75, %cst_19 {dimension_numbers = #tpu.dot_dimension_numbers<[1], [0], [0], [1], [0, 0, 1, 1], [], []>} : vector<16x80xf32>, vector<80x32xf32>, vector<16x32xf32> -> vector<16x32xf32>
    %c0_20 = arith.constant 0 : index
    %c0_21 = arith.constant 0 : index
    %77 = vector.load %arg3[%c0_20, %c0_21] : memref<3x32xf32, #tpu.memory_space<vmem>>, vector<1x32xf32>
    %78 = vector.broadcast %77 : vector<1x32xf32> to vector<16x32xf32>
    %79 = arith.addf %76, %78 : vector<16x32xf32>
    %cst_22 = arith.constant 0.000000e+00 : f32
    %80 = vector.broadcast %cst_22 : f32 to vector<16x32xf32>
    %81 = arith.maximumf %79, %80 : vector<16x32xf32>
    %c0_23 = arith.constant 0 : index
    %c0_24 = arith.constant 0 : index
    %82 = vector.load %arg2[%c0_23, %c0_24] : memref<32x11xf32, #tpu.memory_space<vmem>>, vector<32x11xf32>
    %cst_25 = arith.constant dense<0.000000e+00> : vector<16x11xf32>
    %83 = tpu.matmul %81, %82, %cst_25 {dimension_numbers = #tpu.dot_dimension_numbers<[1], [0], [0], [1], [0, 0, 1, 1], [], []>} : vector<16x32xf32>, vector<32x11xf32>, vector<16x11xf32> -> vector<16x11xf32>
    %c1 = arith.constant 1 : index
    %c0_26 = arith.constant 0 : index
    %84 = vector.load %arg3[%c1, %c0_26] : memref<3x32xf32, #tpu.memory_space<vmem>>, vector<1x11xf32>
    %85 = vector.broadcast %84 : vector<1x11xf32> to vector<16x11xf32>
    %86 = arith.addf %83, %85 : vector<16x11xf32>
    %87 = arith.sitofp %0 : vector<16x8xi32> to vector<16x8xf32>
    %c2 = arith.constant 2 : index
    %c0_27 = arith.constant 0 : index
    %88 = vector.load %arg3[%c2, %c0_27] : memref<3x32xf32, #tpu.memory_space<vmem>>, vector<1x8xf32>
    %89 = vector.broadcast %88 : vector<1x8xf32> to vector<16x8xf32>
    %90 = arith.mulf %87, %89 : vector<16x8xf32>
    %cst_28 = arith.constant dense<0.000000e+00> : vector<16xf32>
    %91 = vector.multi_reduction <add>, %90, %cst_28 [1] : vector<16x8xf32> to vector<16xf32>
    %92 = vector.shape_cast %91 : vector<16xf32> to vector<16x1xf32>
    %93 = math.roundeven %92 : vector<16x1xf32>
    %94 = arith.fptosi %93 : vector<16x1xf32> to vector<16x1xi32>
    %c10_i32_29 = arith.constant 10 : i32
    %c0_i32_30 = arith.constant 0 : i32
    %95 = arith.cmpi eq, %c10_i32_29, %c0_i32_30 : i32
    %c1_i32 = arith.constant 1 : i32
    %96 = arith.select %95, %c1_i32, %c10_i32_29 : i32
    %97 = vector.broadcast %96 : i32 to vector<16x1xi32>
    %98 = arith.remsi %94, %97 : vector<16x1xi32>
    %c0_i32_31 = arith.constant 0 : i32
    %99 = vector.broadcast %c0_i32_31 : i32 to vector<16x1xi32>
    %100 = arith.cmpi ne, %98, %99 : vector<16x1xi32>
    %c0_i32_32 = arith.constant 0 : i32
    %101 = vector.broadcast %c0_i32_32 : i32 to vector<16x1xi32>
    %102 = arith.cmpi slt, %98, %101 : vector<16x1xi32>
    %c0_i32_33 = arith.constant 0 : i32
    %103 = arith.cmpi slt, %96, %c0_i32_33 : i32
    %104 = vector.broadcast %103 : i1 to vector<16x1xi1>
    %105 = vector.broadcast %104 : vector<16x1xi1> to vector<16x1xi1>
    %106 = arith.xori %102, %105 : vector<16x1xi1>
    %107 = arith.andi %106, %100 : vector<16x1xi1>
    %108 = vector.broadcast %96 : i32 to vector<16x1xi32>
    %109 = arith.addi %98, %108 : vector<16x1xi32>
    %110 = arith.select %107, %109, %98 : vector<16x1xi1>, vector<16x1xi32>
    %cst_34 = arith.constant dense<0xFF800000> : vector<16xf32>
    %111 = vector.multi_reduction <maximumf>, %86, %cst_34 [1] : vector<16x11xf32> to vector<16xf32>
    %112 = vector.shape_cast %111 : vector<16xf32> to vector<16x1xf32>
    %113 = vector.broadcast %112 : vector<16x1xf32> to vector<16x11xf32>
    %114 = arith.subf %86, %113 : vector<16x11xf32>
    %115 = math.exp %114 : vector<16x11xf32>
    %cst_35 = arith.constant dense<0.000000e+00> : vector<16xf32>
    %116 = vector.multi_reduction <add>, %115, %cst_35 [1] : vector<16x11xf32> to vector<16xf32>
    %117 = vector.shape_cast %116 : vector<16xf32> to vector<16x1xf32>
    %118 = math.log %117 : vector<16x1xf32>
    %119 = arith.addf %112, %118 : vector<16x1xf32>
    %120 = tpu.iota {dimensions = array<i32: 1>} : vector<16x11xi32>
    %121 = vector.broadcast %110 : vector<16x1xi32> to vector<16x11xi32>
    %122 = arith.cmpi eq, %120, %121 : vector<16x11xi32>
    %cst_36 = arith.constant 0.000000e+00 : f32
    %123 = vector.broadcast %cst_36 : f32 to vector<16x11xf32>
    %124 = arith.select %122, %86, %123 : vector<16x11xi1>, vector<16x11xf32>
    %cst_37 = arith.constant dense<0.000000e+00> : vector<16xf32>
    %125 = vector.multi_reduction <add>, %124, %cst_37 [1] : vector<16x11xf32> to vector<16xf32>
    %126 = vector.shape_cast %125 : vector<16xf32> to vector<16x1xf32>
    %127 = arith.subf %119, %126 : vector<16x1xf32>
    %cst_38 = arith.constant dense<0.000000e+00> : vector<1xf32>
    %128 = vector.multi_reduction <add>, %127, %cst_38 [0] : vector<16x1xf32> to vector<1xf32>
    %129 = vector.shape_cast %128 : vector<1xf32> to vector<1x1xf32>
    %cst_39 = arith.constant 6.250000e-02 : f32
    %130 = vector.broadcast %cst_39 : f32 to vector<1x1xf32>
    %131 = arith.mulf %129, %130 : vector<1x1xf32>
    %c0_40 = arith.constant 0 : index
    %c0_41 = arith.constant 0 : index
    %132 = vector.load %arg4[%c0_40, %c0_41] : memref<1x1xf32, #tpu.memory_space<vmem>>, vector<1x1xf32>
    tpu.vector_store %arg4[%c0_40, %c0_41], %131 {strides = array<i32>} : memref<1x1xf32, #tpu.memory_space<vmem>>, vector<1x1xf32>,
    return
  }
}

</mosaic_0001>

<bundles_post_ra>
// kernel: model_forward.1
= control target key start
LH: loop header
LB: loop body
LE: loop exit
PB: predicated region body
PF: predicated region fallthrough
CT: control target
= control target key end

     0   :  { %v588_v2 = vmov 0   ;;  %s766_s0 = inlined_call_operand.vmem [shape: s32[16,8], index: 0, kind: input, shape index: {}]   ;;  %s767_s1 = inlined_call_operand.vmem [shape: f32[80,32], index: 1, kind: input, shape index: {}]   ;;  %s768_s2 = inlined_call_operand.vmem [shape: f32[32,11], index: 2, kind: input, shape index: {}]   ;;  %s769_s3 = inlined_call_operand.vmem [shape: f32[3,32], index: 3, kind: input, shape index: {}]   ;;  %s770_s4 = inlined_call_operand.hbm [shape: f32[1,1], index: 4, kind: output, shape index: {}]  }
   0x1   :  { %v626_v0 = vld [vmem:[%s766_s0 + $0x8] sm:$0xff]  ;;  %v631_v1 = vld [vmem:[%s766_s0] sm:$0xff]  ;;  %544 = vset.pattern.permute.xlu1 %v588_v2  ;;  %542 = vset.pattern.permute.xlu0 %v588_v2 }
   0x2   :  { %9 = vsyncpa [#allocation3], 0  ;;  %26 = vperm.xlu1 %544, %v626_v0   ;;  %23 = vperm.xlu0 %542, %v631_v1   ;;  %v35_v3 = vadd.s32 10, %v626_v0  ;;  %v34_v4 = vadd.s32 10, %v631_v1  ;;  %v589_v5 = vmov 1   ;;  %v48_v6 = vadd.s32 20, %v631_v1 }
   0x3   :  { %v49_v7 = vadd.s32 20, %v626_v0  ;;  %v590_v8 = vmov 2   ;;  %v62_v9 = vadd.s32 30, %v631_v1  ;;  %v76_v10 = vadd.s32 40, %v631_v1  ;;  %v132_v19 = vld [vmem:[%s767_s1] sm:$0xff]  ;;  %v133_v20 = vld [vmem:[%s767_s1 + $0x8] sm:$0xff] }
   0x4   :  { %v591_v11 = vmov 3   ;;  %v592_v12 = vmov 4   ;;  %v63_v13 = vadd.s32 30, %v626_v0  ;;  %v91_v14 = vadd.s32 50, %v626_v0  ;;  %v134_v23 = vld [vmem:[%s767_s1 + $0x10] sm:$0xff]  ;;  %v135_v24 = vld [vmem:[%s767_s1 + $0x18] sm:$0xff] }
   0x5   :  { %v593_v15 = vmov 5   ;;  %v77_v16 = vadd.s32 40, %v626_v0  ;;  %v118_v17 = vadd.s32 70, %v631_v1  ;;  %v594_v18 = vmov 7   ;;  %v136_v27 = vld [vmem:[%s767_s1 + $0x20] sm:$0xff]  ;;  %v137_v28 = vld [vmem:[%s767_s1 + $0x28] sm:$0xff] }
   0x6   :  { %545 = vset.pattern.permute.xlu1 %v589_v5  ;;  %543 = vset.pattern.permute.xlu0 %v589_v5  ;;  %v90_v21 = vadd.s32 50, %v631_v1  ;;  %v494_v22 = vpack.c.bf16 %v133_v20, %v132_v19  ;;  %v498_v25 = vpack.c.bf16 %v135_v24, %v134_v23  ;;  %v104_v26 = vadd.s32 60, %v631_v1  ;;  %v138_v32 = vld [vmem:[%s767_s1 + $0x30] sm:$0xff]  ;;  %v139_v33 = vld [vmem:[%s767_s1 + $0x38] sm:$0xff]  ;;  %v140_v36 = vld [vmem:[%s767_s1 + $0x40] sm:$0xff] }
   0x7   :  { %40 = vperm.xlu1 %545, %v35_v3   ;;  %37 = vperm.xlu0 %543, %v34_v4   ;;  %v595_v29 = vmov 6   ;;  %v502_v30 = vpack.c.bf16 %v137_v28, %v136_v27  ;;  %v105_v31 = vadd.s32 60, %v626_v0  ;;  %v506_v34 = vpack.c.bf16 %v139_v33, %v138_v32  ;;  %v141_v37 = vld [vmem:[%s767_s1 + $0x48] sm:$0xff]  ;;  %v231_v39 = vld [vmem:[%s768_s2] sm:$0xff] }
   0x8   :  { %495 = vmatprep.subr.bf16.mxu0 %v494_v22  ;;  %v119_v35 = vadd.s32 70, %v626_v0  ;;  %v510_v38 = vpack.c.bf16 %v141_v37, %v140_v36  ;;  %v232_v40 = vld [vmem:[%s768_s2 + $0x8] sm:$0xff]  ;;  %v20_v46 = vlaneseq  ;;  %v596_v52 = vmov 0.0   ;;  %v433_v32 = vld [vmem:[%s769_s3] ss:$0 sm:$0xff] }
   0x9   :  { %497 = vmatpush3.bf16.msra.mxu0 %v494_v22  ;;  %v514_v41 = vpack.c.bf16 %v232_v40, %v231_v39  ;;  %vm147_vm14 = vcmask 654336   ;;  %v322_v39 = vcvt.s32.f32 %v631_v1  ;;  %v436_v40 = vld [vmem:[%s769_s3 + $0x1] ss:$0 sm:$0xff] }
   0xa   :  { %499 = vmatprep.subr.bf16.mxu0 %v498_v25  ;;  %v685_v48 = vand.u32 127, %v20_v46 }
   0xb   :  { %546 = vset.pattern.permute.xlu1 %v590_v8  ;;  %547 = vset.pattern.permute.xlu0 %v590_v8 }
   0xc   :  { %51 = vperm.xlu1 %546, %v48_v6   ;;  %54 = vperm.xlu0 %547, %v49_v7  }
   0xd   :  { %501 = vmatpush3.bf16.msra.mxu0 %v498_v25  ;;  %515 = vmatprep.subr.bf16.mxu1 %v514_v41 }
   0xe   :  { %503 = vmatprep.subr.bf16.mxu0 %v502_v30  ;;  %517 = vmatpush3.bf16.msra.mxu1 %v514_v41  ;;  %v439_v41 = vld [vmem:[%s769_s3 + $0x2] ss:$0 sm:$0xff]  ;;  %s597_s3 = smov [#allocation2]  }
   0xf   :  { %v329_v46 = vmul.f32 %v439_v41, %v322_v39  ;;  %s425_s23 = sshll.u32 %s597_s3, 4  ;;  %s426_s23 = int_to_ptr.vmem [resolvable:$true] %s425_s23 }
  0x10   :  { %548 = vset.pattern.permute.xlu1 %v591_v11  ;;  %549 = vset.pattern.permute.xlu0 %v592_v12  ;;  %s564_s24 = scalar_lea.vmem %s426_s23, 16  ;;  %s568_s25 = scalar_lea.vmem %s426_s23, 32 }
  0x11   :  { %65 = vperm.xlu1 %548, %v62_v9   ;;  %79 = vperm.xlu0 %549, %v76_v10   ;;  %p565_p0 = scmp.ne.s32.totalorder %s426_s23, %s564_s24  ;;  %p569_p1 = scmp.lt.s32.totalorder %s426_s23, %s426_s23 }
  0x12   :  { %505 = vmatpush3.bf16.msra.mxu0 %v502_v30  ;;  %v234_v30 = vld [vmem:[%s768_s2 + $0x18] sm:$0xff]  ;;  %p570_p2 = scmp.lt.s32.totalorder %s568_s25, %s564_s24 }
  0x13   :  { %507 = vmatprep.subr.bf16.mxu0 %v506_v34 }
  0x14   :  { %p571_p3 = por %p570_p2, %p569_p1 }
  0x15   :  { %68 = vperm.xlu1 %548, %v63_v13   ;;  %552 = vset.pattern.permute.xlu0 %v593_v15 }
  0x16   :  { %96 = vperm.xlu0 %552, %v91_v14   ;;  %509 = vmatpush3.bf16.msra.mxu0 %v506_v34  ;;  %p572_p4 = pnand %p571_p3, %p565_p0 }
  0x17   :  { %511 = vmatprep.subr.bf16.mxu0 %v510_v38 }
  0x19   :  { %550 = vset.pattern.permute.xlu1 %v592_v12 }
  0x1a   :  { %82 = vperm.xlu1 %550, %v77_v16   ;;  %554 = vset.pattern.permute.xlu0 %v594_v18 }
  0x1b   :  { %121 = vperm.xlu0 %554, %v118_v17   ;;  %513 = vmatpush3.bf16.msra.mxu0 %v510_v38 }
  0x1e   :  { %551 = vset.pattern.permute.xlu1 %v593_v15 }
  0x1f   :  { %93 = vperm.xlu1 %551, %v90_v21  }
  0x23   :  { %553 = vset.pattern.permute.xlu1 %v595_v29  ;;  %v233_v29 = vld [vmem:[%s768_s2 + $0x10] sm:$0xff] }
  0x24   :  { %107 = vperm.xlu1 %553, %v104_v26  }
  0x28   :  { %110 = vperm.xlu1 %553, %v105_v31   ;;  %v518_v31 = vpack.c.bf16 %v234_v30, %v233_v29 }
  0x2a   :  { %519 = vmatprep.subr.bf16.mxu1 %v518_v31 }
  0x2b   :  { %521 = vmatpush3.bf16.msra.mxu1 %v518_v31 }
  0x2c   :  { %555 = vset.pattern.permute.xlu1 %v594_v18 }
  0x2d   :  { %124 = vperm.xlu1 %555, %v119_v35  }
  0x81   :  { %v27_v42 = vpop.permute.xlu1 %26  ;;  %v24_v44 = vpop.permute.xlu0 %23 }
  0x82   :  { %vm28_vm0 = vcmp.eq.s32.totalorder %v685_v48, %v24_v44  ;;  %vm29_vm6 = vcmp.eq.s32.totalorder %v685_v48, %v27_v42  ;;  %v323_v42 = vcvt.s32.f32 %v626_v0 }
  0x83   :  { %v30_v53 = vsel %vm28_vm0, 1.0, %v596_v52  ;;  %v31_v5 = vsel %vm29_vm6, 1.0, %v596_v52 }
  0x84   :  { %v330_v1 = vmul.f32 %v439_v41, %v323_v42 }
  0x86   :  { %v41_v43 = vpop.permute.xlu1 %40  ;;  %v38_v47 = vpop.permute.xlu0 %37 }
  0x87   :  { %vm42_vm1 = vcmp.eq.s32.totalorder %v685_v48, %v38_v47  ;;  %vm43_vm4 = vcmp.eq.s32.totalorder %v685_v48, %v41_v43 }
  0x88   :  { %v44_v54 = vsel %vm42_vm1, 1.0, %v596_v52  ;;  %v45_v62 = vsel %vm43_vm4, 1.0, %v596_v52  ;;  %vm240_vm1 = vcmask 261120  }
  0x89   :  { %v46_v56 = vadd.f32 %v44_v54, %v30_v53  ;;  %v47_v7 = vadd.f32 %v45_v62, %v31_v5 }
  0x8b   :  { %v52_v45 = vpop.permute.xlu1 %51  ;;  %v55_v50 = vpop.permute.xlu0 %54 }
  0x8c   :  { %vm56_vm2 = vcmp.eq.s32.totalorder %v685_v48, %v52_v45  ;;  %vm57_vm7 = vcmp.eq.s32.totalorder %v685_v48, %v55_v50 }
  0x8d   :  { %v58_v57 = vsel %vm56_vm2, 1.0, %v596_v52  ;;  %v59_v6 = vsel %vm57_vm7, 1.0, %v596_v52  ;;  %vm372_vm2 = vcmask 89088  }
  0x8e   :  { %v60_v61 = vadd.f32 %v58_v57, %v46_v56  ;;  %v61_v11 = vadd.f32 %v59_v6, %v47_v7 }
  0x90   :  { %v66_v49 = vpop.permute.xlu1 %65  ;;  %v80_v55 = vpop.permute.xlu0 %79 }
  0x91   :  { %vm70_vm3 = vcmp.eq.s32.totalorder %v685_v48, %v66_v49  ;;  %vm84_vm5 = vcmp.eq.s32.totalorder %v685_v48, %v80_v55 }
  0x92   :  { %v72_v59 = vsel %vm70_vm3, 1.0, %v596_v52  ;;  %v86_v3 = vsel %vm84_vm5, 1.0, %v596_v52  ;;  %vm331_vm3 = vcmask 64512  }
  0x93   :  { %v74_v63 = vadd.f32 %v72_v59, %v60_v61  ;;  %v335_v0 = vsel %vm331_vm3, %v330_v1, 0.0 }
  0x94   :  { %v69_v51 = vpop.permute.xlu1 %68 }
  0x95   :  { %v97_v60 = vpop.permute.xlu0 %96  ;;  %vm71_vm8 = vcmp.eq.s32.totalorder %v685_v48, %v69_v51  ;;  %v88_v9 = vadd.f32 %v86_v3, %v74_v63  ;;  %v332_v51 = vsel %vm331_vm3, %v329_v46, 0.0 }
  0x96   :  { %v73_v10 = vsel %vm71_vm8, 1.0, %v596_v52  ;;  %vm99_vm13 = vcmp.eq.s32.totalorder %v685_v48, %v97_v60 }
  0x97   :  { %v75_v15 = vadd.f32 %v73_v10, %v61_v11  ;;  %v101_v21 = vsel %vm99_vm13, 1.0, %v596_v52 }
  0x99   :  { %v83_v58 = vpop.permute.xlu1 %82 }
  0x9a   :  { %v122_v4 = vpop.permute.xlu0 %121  ;;  %vm85_vm10 = vcmp.eq.s32.totalorder %v685_v48, %v83_v58 }
  0x9b   :  { %vm126_vm11 = vcmp.eq.s32.totalorder %v685_v48, %v122_v4  ;;  %v87_v13 = vsel %vm85_vm10, 1.0, %v596_v52 }
  0x9c   :  { %v128_v17 = vsel %vm126_vm11, 1.0, %v596_v52  ;;  %v89_v19 = vadd.f32 %v87_v13, %v75_v15 }
  0x9e   :  { %v94_v2 = vpop.permute.xlu1 %93  ;;  %v103_v24 = vadd.f32 %v101_v21, %v89_v19 }
  0x9f   :  { %vm98_vm9 = vcmp.eq.s32.totalorder %v685_v48, %v94_v2 }
  0xa0   :  { %v100_v8 = vsel %vm98_vm9, 1.0, %v596_v52 }
  0xa1   :  { %v102_v14 = vadd.f32 %v100_v8, %v88_v9 }
  0xa3   :  { %v108_v12 = vpop.permute.xlu1 %107 }
  0xa4   :  { %vm112_vm12 = vcmp.eq.s32.totalorder %v685_v48, %v108_v12 }
  0xa5   :  { %v114_v16 = vsel %vm112_vm12, 1.0, %v596_v52 }
  0xa6   :  { %v116_v18 = vadd.f32 %v114_v16, %v102_v14 }
  0xa7   :  { %v111_v20 = vpop.permute.xlu1 %110 }
  0xa8   :  { %vm113_vm15 = vcmp.eq.s32.totalorder %v685_v48, %v111_v20  ;;  %v130_v22 = vadd.f32 %v128_v17, %v116_v18 }
  0xa9   :  { %v115_v23 = vsel %vm113_vm15, 1.0, %v596_v52 }
  0xaa   :  { %480 = vmatprep.mubr.msk.f32.mxu0 %vm147_vm14, %v130_v22  ;;  %v117_v26 = vadd.f32 %v115_v23, %v103_v24 }
  0xac   :  { %v125_v25 = vpop.permute.xlu1 %124 }
  0xad   :  { %vm127_vm0 = vcmp.eq.s32.totalorder %v685_v48, %v125_v25 }
  0xae   :  { %v129_v27 = vsel %vm127_vm0, 1.0, %v596_v52 }
  0xaf   :  { %v131_v28 = vadd.f32 %v129_v27, %v117_v26 }
  0xb1   :  { %481 = vmatmul.mubr.msk.f32.vlgmr.msra.gmra.mrb[0].mxu0 %vm147_vm14, %v131_v28  ;;  %vm417_vm14 = vcmask 0  }
 0x184   :  { %v482_v33 = vpop.f32.mrb[0].mxu0 }
 0x185   :  { %v226_v34 = vadd.f32 %v482_v33, %v433_v32  ;;  %v220_v35 = vpop.f32.mrb[1].mxu0 }
 0x186   :  { %v221_v36 = vadd.f32 %v433_v32, %v220_v35 }
 0x187   :  { %v230_v38 = vmax.f32 %v226_v34, 0.0 }
 0x188   :  { %v229_v37 = vmax.f32 %v221_v36, 0.0 }
 0x18a   :  { %491 = vmatprep.mubr.msk.f32.mxu1 %vm240_vm1, %v229_v37 }
 0x18b   :  { %492 = vmatmul.mubr.msk.f32.vlgmr.msra.gmra.mrb[0].mxu1 %vm240_vm1, %v230_v38 }
 0x25e   :  { %v493_v43 = vpop.f32.mrb[0].mxu1 }
 0x25f   :  { %v720_v44 = vadd.f32 %v493_v43, %v436_v40  ;;  %v313_v45 = vpop.f32.mrb[1].mxu1 }
 0x260   :  { %v722_v47 = vadd.f32 %v436_v40, %v313_v45 }
 0x261   :  { %v376_v49 = vsel %vm372_vm2, %v720_v44, -inf }
 0x262   :  { %377 = vmax.xlane.f32.xlu0 %v376_v49  ;;  %v373_v50 = vsel %vm372_vm2, %v722_v47, -inf }
 0x263   :  { %374 = vmax.xlane.f32.xlu1 %v373_v50 }
 0x266   :  { %333 = vadd.xlane.f32.xlu0 %v332_v51 }
 0x267   :  { %336 = vadd.xlane.f32.xlu1 %v335_v0 }
 0x2ef   :  { %v728_v52 = vpop.xlane.xlu0 %377 }
 0x2f0   :  { %v380_v53 = vsub.f32 %v720_v44, %v728_v52  ;;  %v732_v54 = vpop.xlane.xlu1 %374 }
 0x2f1   :  { %v379_v55 = vsub.f32 %v722_v47, %v732_v54 }
 0x2f2   :  { %v383_v56 = vmul.f32 1.442695, %v380_v53 }
 0x2f3   :  { %v381_v57 = vmul.f32 1.442695, %v379_v55  ;;  %v334_v58 = vpop.xlane.xlu0 %333 }
 0x2f4   :  { %556 = vpow2.f32 %v383_v56  ;;  %v524_v59 = vcvt.f32.s32 %v334_v58  ;;  %v337_v60 = vpop.xlane.xlu1 %336 }
 0x2f5   :  { %558 = vpow2.f32 %v381_v57  ;;  %v527_v61 = vcvt.f32.s32 %v337_v60 }
 0x2f6   :  { %v341_v62 = vsub.s32 0, %v524_v59  ;;  %vm340_vm4 = vcmp.lt.s32.totalorder %v524_v59, 0 }
 0x2f7   :  { %v352_v63 = vsub.s32 0, %v527_v61  ;;  %vm351_vm5 = vcmp.lt.s32.totalorder %v527_v61, 0 }
 0x2f8   :  { %v440_v2 = vmin.u32 %v524_v59, %v341_v62 }
 0x2f9   :  { %v441_v3 = vmin.u32 %v527_v61, %v352_v63 }
 0x2fa   :  { %v736_v4 = vmul.u32.u64.low 3435973837, %v440_v2  ;;  %v737_v5 = vmul.u32.u64.high 3435973837, %v440_v2, %v736_v4 }
 0x2fb   :  { %v739_v6 = vmul.u32.u64.low 3435973837, %v441_v3  ;;  %v740_v7 = vmul.u32.u64.high 3435973837, %v441_v3, %v739_v6 }
 0x2fc   :  { %v346_v9 = vshrl.u32 %v737_v5, 3 }
 0x2fd   :  { %v357_v11 = vshrl.u32 %v740_v7, 3 }
 0x2fe   :  { %v557_v8 = vpop.eup %556  ;;  %v347_v13 = vmul.u32 10, %v346_v9 }
 0x2ff   :  { %v559_v10 = vpop.eup %558  ;;  %v388_v12 = vsel %vm372_vm2, %v557_v8, 0.0  ;;  %v358_v15 = vmul.u32 10, %v357_v11 }
 0x300   :  { %389 = vadd.xlane.f32.xlu1 %v388_v12  ;;  %v385_v14 = vsel %vm372_vm2, %v559_v10, 0.0  ;;  %v348_v16 = vsub.s32 %v440_v2, %v347_v13 }
 0x301   :  { %386 = vadd.xlane.f32.xlu0 %v385_v14  ;;  %v359_v17 = vsub.s32 %v441_v3, %v358_v15 }
 0x302   :  { %v349_v18 = vsub.s32 0, %v348_v16 }
 0x303   :  { %v360_v19 = vsub.s32 0, %v359_v17 }
 0x304   :  { %v350_v20 = vsel %vm340_vm4, %v349_v18, %v348_v16 }
 0x305   :  { %v361_v21 = vsel %vm351_vm5, %v360_v19, %v359_v17  ;;  %vm362_vm6 = vcmp.ne.s32.totalorder %v350_v20, 0  ;;  %vm364_vm7 = vcmp.lt.s32.totalorder %v350_v20, 0  ;;  %v368_v22 = vadd.s32 10, %v350_v20 }
 0x306   :  { %vm366_vm8 = vmand %vm364_vm7, %vm362_vm6  ;;  %vm363_vm9 = vcmp.ne.s32.totalorder %v361_v21, 0  ;;  %vm365_vm10 = vcmp.lt.s32.totalorder %v361_v21, 0  ;;  %v369_v23 = vadd.s32 10, %v361_v21 }
 0x307   :  { %v370_v24 = vsel %vm366_vm8, %v368_v22, %v350_v20  ;;  %vm367_vm11 = vmand %vm365_vm10, %vm363_vm9 }
 0x308   :  { %vm397_vm12 = vcmp.eq.s32.totalorder %v685_v48, %v370_v24  ;;  %v371_v25 = vsel %vm367_vm11, %v369_v23, %v361_v21 }
 0x309   :  { %v399_v26 = vsel %vm397_vm12, %v722_v47, 0.0  ;;  %vm398_vm13 = vcmp.eq.s32.totalorder %v685_v48, %v371_v25 }
 0x30a   :  { %v401_v27 = vsel %vm372_vm2, %v399_v26, 0.0  ;;  %v400_v28 = vsel %vm398_vm13, %v720_v44, 0.0 }
 0x30b   :  { %402 = vadd.xlane.f32.xlu0 %v401_v27  ;;  %v404_v29 = vsel %vm372_vm2, %v400_v28, 0.0 }
 0x30c   :  { %405 = vadd.xlane.f32.xlu1 %v404_v29 }
 0x38d   :  { %v390_v30 = vpop.xlane.xlu1 %389 }
 0x38e   :  { %560 = vlog2.f32 %v390_v30  ;;  %v387_v31 = vpop.xlane.xlu0 %386 }
 0x38f   :  { %562 = vlog2.f32 %v387_v31 }
 0x398   :  { %v561_v32 = vpop.eup %560  ;;  %v403_v38 = vpop.xlane.xlu0 %402 }
 0x399   :  { %v563_v33 = vpop.eup %562  ;;  %v394_v34 = vmul.f32 0.6931472, %v561_v32  ;;  %v406_v37 = vpop.xlane.xlu1 %405 }
 0x39a   :  { %v392_v35 = vmul.f32 0.6931472, %v563_v33 }
 0x39b   :  { %v396_v36 = vadd.f32 %v394_v34, %v728_v52 }
 0x39c   :  { %v395_v48 = vadd.f32 %v392_v35, %v732_v54 }
 0x39d   :  { %v408_v39 = vsub.f32 %v396_v36, %v406_v37 }
 0x39e   :  { %v407_v40 = vsub.f32 %v395_v48, %v403_v38 }
 0x3a0   :  { %v409_v41 = vadd.f32 %v408_v39, %v407_v40 }
 0x3a2   :  { %v410_v42 = vrot.slane %v409_v41, 4 }
 0x3a4   :  { %v411_v43 = vadd.f32 %v410_v42, %v409_v41 }
 0x3a6   :  { %v412_v44 = vrot.slane %v411_v43, 2 }
 0x3a8   :  { %v413_v45 = vadd.f32 %v412_v44, %v411_v43 }
 0x3aa   :  { %v414_v46 = vrot.slane %v413_v45, 1 }
 0x3ac   :  { %v415_v47 = vadd.f32 %v414_v46, %v413_v45 }
 0x3ae   :  { %v416_v1 = vmul.f32 0.0625, %v415_v47 }
 0x3b0   :  { %418 = vst.msk [vmem:[#allocation2] sm:$0x1] %vm417_vm14, %v416_v1 }
 0x3b1   :  { %575 = shalt.err (!%p572_p4)
}
 0x3b2   :  { %s576_s28 = scalar_lea.hbm %s770_s4, 16 }
 0x3b3   :  { %p577_p5 = scmp.ne.s32.totalorder %s770_s4, %s576_s28  ;;  %p580_p6 = scmp.lt.u32.totalorder %s576_s28, %s770_s4 }
 0x3b5   :  { %p582_p7 = pnand %p580_p6, %p577_p5 }
 0x3b7   :  { %585 = shalt.err (!%p582_p7)
}
 0x3b8   :  { %428 = dma.vmem_to_hbm [thread:$0]  %s426_s23, 16, %s770_s4, [#allocation3]  }
 0x3b9   :  { %586 = dma.done.wait [#allocation3], 16  }
 0x3ba   :  { %587 = vsyncadd [#allocation3], 4294967280 }
 0x3bb   :  { %432 = vsyncpa [#allocation3], 1 }

</bundles_post_ra>
